<compile_context>
chip_gen: v7x
topology: tpu7x:2x2x1
jax: 0.10.0
libtpu: 0.0.40
codegen_flags: <defaults>
</compile_context>

<pallas_src>
import functools
from dataclasses import dataclass

import jax
import jax.numpy as jnp
from jax.experimental import pallas as pl
from jax.experimental.pallas import tpu as pltpu


@dataclass
class DMConfig:
    T: int = 50
    beta_1: float = 1e-4
    beta_T: float = 0.02
    mask_p: float = 0.1
    num_feat: int = 32
    num_classes: int = 10
    num_channels: int = 1
    input_dim: tuple = (16, 16)


# --------------------------------------------------------------------------- 3x3 tap helpers
def _tap_offsets(H, W):
    # tap k = (di+1)*3 + (dj+1); flattened-index offset of the source pixel = di*W + dj
    return tuple(di * W + dj for di in (-1, 0, 1) for dj in (-1, 0, 1))


def _tap_masks(H, W):
    # masks[k, p] = 1.0 iff output pixel p's tap-k source (i+di, j+dj) is inside the image
    i = jnp.arange(H)[:, None]
    j = jnp.arange(W)[None, :]
    rows = []
    for di in (-1, 0, 1):
        for dj in (-1, 0, 1):
            ok = (i + di >= 0) & (i + di < H) & (j + dj >= 0) & (j + dj < W)
            rows.append(ok.reshape(-1))
    return jnp.stack(rows, axis=0).astype(jnp.float32)  # (9, H*W)


# --------------------------------------------------------------------------- fused kernel
def _fused_ddpm_kernel(img_ref, noise_ref, sa_ref, sb_ref, cond_ref,
                       w1_ref, w2_ref, masks_ref, b2_ref, loss_ref,
                       patches_ref, *, offsets, inv_n):
    """One grid step = one lane-dense batch tile (rows x (BT*H*W) lanes).

    q_sample -> masked im2col (lane rolls) -> conv1 on MXU (+cond, ReLU)
             -> conv2 (MXU F-contraction + per-tap shift/mask/sum) -> SSE accumulate.
    """
    step = pl.program_id(0)

    @pl.when(step == 0)
    def _init():
        loss_ref[0, 0] = 0.0

    tile = img_ref.shape[1]                                     # BT * H * W (static)

    noise = noise_ref[...]                                      # (1, TILE)
    # q-sample: x_t = img * sqrt(alpha_bar_t) + noise * sqrt(1 - alpha_bar_t)
    x_t = img_ref[...] * sa_ref[...] + noise * sb_ref[...]      # (1, TILE)

    masks = masks_ref[...]                                      # (9, TILE)

    # ---- masked 3x3 im2col: 9 lane rotations of x_t, zeroed outside the image ----
    for k, off in enumerate(offsets):
        sh = x_t if off == 0 else pltpu.roll(x_t, shift=(-off) % tile, axis=1)
        patches_ref[pl.ds(k, 1), :] = sh * masks[k:k + 1, :]

    # ---- conv1 (1 -> F) on the MXU, + (cond embed + conv1 bias), ReLU ----
    h1 = jnp.maximum(
        jnp.dot(w1_ref[...], patches_ref[...],
                preferred_element_type=jnp.float32) + cond_ref[...],
        0.0)                                                    # (F, TILE), VMEM-resident

    # ---- conv2 (F -> 1): per-tap F-contraction on the MXU, shift+mask+sum on VPU/XLU ----
    g = jnp.dot(w2_ref[...], h1, preferred_element_type=jnp.float32)   # (9, TILE)
    out = jnp.zeros((1, tile), jnp.float32)
    for k, off in enumerate(offsets):
        row = g[k:k + 1, :]
        sh = row if off == 0 else pltpu.roll(row, shift=(-off) % tile, axis=1)
        out = out + sh * masks[k:k + 1, :]
    pred = out + b2_ref[0, 0]                                   # (1, TILE)

    # ---- fused MSE: accumulate squared error for this batch tile ----
    d = noise - pred
    loss_ref[0, 0] += jnp.sum(d * d)

    @pl.when(step == pl.num_programs(0) - 1)
    def _finalize():
        loss_ref[0, 0] = loss_ref[0, 0] * inv_n


# --------------------------------------------------------------------------- params / glue
def make_network_params(key, cfg):
    """Stand-in ConditionalUnet(1, num_feat, num_classes) parameters.

    w1[f, k] ~ conv1.weight[f, 0, k//3, k%3]   (shape (F, 9))
    w2[k, f] ~ conv2.weight[0, f, k//3, k%3]   (shape (9, F)) — pre-transposed so the
    kernel's MXU contraction needs no in-kernel transpose.
    """
    F, NC = cfg.num_feat, cfg.num_classes
    k = jax.random.split(key, 3)
    return {
        "wc": 0.05 * jax.random.normal(k[0], (1 + NC, F), jnp.float32),
        "bc": jnp.zeros((F,), jnp.float32),
        "w1": 0.05 * jax.random.normal(k[1], (F, 9), jnp.float32),
        "b1": jnp.zeros((F,), jnp.float32),
        "w2": 0.05 * jax.random.normal(k[2], (9, F), jnp.float32),
        "b2": jnp.zeros((1, 1), jnp.float32),
    }


def ddpm_forward(params, cfg, images_nchw, conditions, key):
    """Mirrors ConditionalDDPM.forward: scalar MSE between the true and predicted noise."""
    B = images_nchw.shape[0]
    H, W = cfg.input_dim
    HW = H * W
    F = cfg.num_feat

    k_t, k_noise, k_mask = jax.random.split(key, 3)

    # ---- scheduler / sampling glue (tiny; stays in XLA) ----
    t_s = jax.random.randint(k_t, (B,), 1, cfg.T + 1)
    beta = jnp.linspace(cfg.beta_1, cfg.beta_T, cfg.T).astype(jnp.float32)
    alpha_bar = jnp.cumprod(1.0 - beta)
    sa = jnp.sqrt(alpha_bar)[t_s - 1]                            # (B,) sqrt(alpha_bar_t)
    sb = jnp.sqrt(1.0 - alpha_bar)[t_s - 1]                      # (B,) sqrt(1 - alpha_bar_t)

    noise = jax.random.normal(k_noise, (B, HW), dtype=jnp.float32)
    img = images_nchw.reshape(B, HW).astype(jnp.float32)         # C == 1

    # ---- conditioning: t/T + classifier-free-guidance-masked one-hot (glue) ----
    t_view = (t_s.astype(jnp.float32) / cfg.T).reshape(B, 1)
    onehot = jax.nn.one_hot(conditions, cfg.num_classes, dtype=jnp.float32)
    keep = jax.random.bernoulli(k_mask, 1.0 - cfg.mask_p, (B,)).astype(jnp.float32)
    keep = jnp.broadcast_to(keep[:, None], (B, cfg.num_classes))
    onehot_masked = onehot * keep + (keep - 1.0)                 # dropped condition -> all -1
    tc = jnp.concatenate([t_view, onehot_masked], axis=1)        # (B, 1 + num_classes)
    # ~700 MACs: keep the embedding matmul in XLA; fold conv1's bias in as well.
    cond = tc @ params["wc"] + params["bc"] + params["b1"]       # (B, F)

    # ---- lane-dense packing: fold the batch into the lane axis ----
    BT = B                     # whole demo batch in one tile
    assert B % BT == 0         # TODO(synk): for large B pick BT so BT*HW fits VMEM comfortably
    num_tiles = B // BT
    TILE = BT * HW

    img_flat = img.reshape(1, B * HW)
    noise_flat = noise.reshape(1, B * HW)
    sa_pix = jnp.broadcast_to(sa[:, None], (B, HW)).reshape(1, B * HW)
    sb_pix = jnp.broadcast_to(sb[:, None], (B, HW)).reshape(1, B * HW)
    # cond_full[f, b*HW + p] = cond[b, f]  (+ conv1 bias already folded in)
    cond_full = jnp.broadcast_to(cond.T[:, :, None], (F, B, HW)).reshape(F, B * HW)

    masks_tiled = jnp.tile(_tap_masks(H, W), (1, BT))            # (9, BT*HW)
    offsets = _tap_offsets(H, W)

    kernel = functools.partial(_fused_ddpm_kernel, offsets=offsets,
                               inv_n=1.0 / (B * HW))
    loss = pl.pallas_call(
        kernel,
        out_shape=jax.ShapeDtypeStruct((1, 1), jnp.float32),
        grid=(num_tiles,),
        in_specs=[
            pl.BlockSpec((1, TILE), lambda i: (0, i)),           # images (flattened, lane-dense)
            pl.BlockSpec((1, TILE), lambda i: (0, i)),           # noise
            pl.BlockSpec((1, TILE), lambda i: (0, i)),           # per-pixel sqrt(alpha_bar_t)
            pl.BlockSpec((1, TILE), lambda i: (0, i)),           # per-pixel sqrt(1-alpha_bar_t)
            pl.BlockSpec((F, TILE), lambda i: (0, i)),           # cond embed (+ conv1 bias)
            pl.BlockSpec((F, 9), lambda i: (0, 0)),              # conv1 weights (F, tap)
            pl.BlockSpec((9, F), lambda i: (0, 0)),              # conv2 weights (tap, F)
            pl.BlockSpec((9, TILE), lambda i: (0, 0)),           # 3x3 border masks (tiled per batch)
            pl.BlockSpec(memory_space=pltpu.MemorySpace.SMEM),   # conv2 bias scalar
        ],
        out_specs=pl.BlockSpec(memory_space=pltpu.MemorySpace.SMEM),
        scratch_shapes=[pltpu.VMEM((9, TILE), jnp.float32)],     # in-kernel masked im2col
        compiler_params=pltpu.CompilerParams(
            # the batch-tile axis carries the SSE accumulator -> must be arbitrary
            dimension_semantics=("arbitrary",),
            vmem_limit_bytes=32 * 1024 * 1024,
        ),
    )(img_flat, noise_flat, sa_pix, sb_pix, cond_full,
      params["w1"], params["w2"], masks_tiled, params["b2"])
    return loss[0, 0]


if __name__ == "__main__":
    cfg = DMConfig()
    key = jax.random.PRNGKey(0)
    k_img, k_cond, k_param, k_fwd = jax.random.split(key, 4)

    images = jax.random.normal(k_img, (2, 1, 16, 16), dtype=jnp.float32)  # NCHW, C == 1
    conditions = jax.random.randint(k_cond, (2,), 0, cfg.num_classes)
    params = make_network_params(k_param, cfg)

    fwd = jax.jit(lambda p, im, co, k: ddpm_forward(p, cfg, im, co, k))
    loss = fwd(params, images, conditions, k_fwd)
    jax.block_until_ready(loss)
    assert loss.shape == () and bool(jnp.isfinite(loss))
    print("KERNEL_OK")
</pallas_src>

<mosaic_0001>
module attributes {stable_mosaic.version = 11 : i64} {
  func.func @_fused_ddpm_kernel(%arg0: i32, %arg1: memref<1x512xf32, #tpu.memory_space<vmem>>, %arg2: memref<1x512xf32, #tpu.memory_space<vmem>>, %arg3: memref<1x512xf32, #tpu.memory_space<vmem>>, %arg4: memref<1x512xf32, #tpu.memory_space<vmem>>, %arg5: memref<32x512xf32, #tpu.memory_space<vmem>>, %arg6: memref<32x9xf32, #tpu.memory_space<vmem>>, %arg7: memref<9x32xf32, #tpu.memory_space<vmem>>, %arg8: memref<9x512xf32, #tpu.memory_space<vmem>>, %arg9: memref<1x1xf32, #tpu.memory_space<smem>>, %arg10: memref<1x1xf32, #tpu.memory_space<smem>>, %arg11: memref<9x512xf32, #tpu.memory_space<vmem>>) attributes {dimension_semantics = [#tpu.dimension_semantics<arbitrary>], iteration_bounds = array<i64: 1>, scalar_prefetch = 0 : i64, scratch_operands = 1 : i64, tpu.core_type = #tpu.core_type<tc>, window_params = [{transform_indices = @transform_0, window_bounds = array<i64: 1, 512>}, {transform_indices = @transform_1, window_bounds = array<i64: 1, 512>}, {transform_indices = @transform_2, window_bounds = array<i64: 1, 512>}, {transform_indices = @transform_3, window_bounds = array<i64: 1, 512>}, {transform_indices = @transform_4, window_bounds = array<i64: 32, 512>}, {pipeline_mode = #tpu.pipeline_mode<synchronous>, transform_indices = @transform_5, window_bounds = array<i64: 32, 9>}, {pipeline_mode = #tpu.pipeline_mode<synchronous>, transform_indices = @transform_6, window_bounds = array<i64: 9, 32>}, {pipeline_mode = #tpu.pipeline_mode<synchronous>, transform_indices = @transform_7, window_bounds = array<i64: 9, 512>}, {transform_indices = @transform_8, window_bounds = array<i64: 1, 1>}, {transform_indices = @transform_9, window_bounds = array<i64: 1, 1>}]} {
    %c0_i32 = arith.constant 0 : i32
    %0 = arith.cmpi eq, %arg0, %c0_i32 : i32
    %1 = arith.extui %0 : i1 to i32
    %c0_i32_0 = arith.constant 0 : i32
    %2 = arith.cmpi ne, %1, %c0_i32_0 : i32
    scf.if %2 {
      %cst_48 = arith.constant 0.000000e+00 : f32
      %c0_49 = arith.constant 0 : index
      %c0_50 = arith.constant 0 : index
      %115 = memref.load %arg10[%c0_49, %c0_50] : memref<1x1xf32, #tpu.memory_space<smem>>
      memref.store %cst_48, %arg10[%c0_49, %c0_50] : memref<1x1xf32, #tpu.memory_space<smem>>
    } else {
    }
    %c0 = arith.constant 0 : index
    %c0_1 = arith.constant 0 : index
    %3 = vector.load %arg2[%c0, %c0_1] : memref<1x512xf32, #tpu.memory_space<vmem>>, vector<1x512xf32>
    %c0_2 = arith.constant 0 : index
    %c0_3 = arith.constant 0 : index
    %4 = vector.load %arg1[%c0_2, %c0_3] : memref<1x512xf32, #tpu.memory_space<vmem>>, vector<1x512xf32>
    %c0_4 = arith.constant 0 : index
    %c0_5 = arith.constant 0 : index
    %5 = vector.load %arg3[%c0_4, %c0_5] : memref<1x512xf32, #tpu.memory_space<vmem>>, vector<1x512xf32>
    %6 = arith.mulf %4, %5 : vector<1x512xf32>
    %c0_6 = arith.constant 0 : index
    %c0_7 = arith.constant 0 : index
    %7 = vector.load %arg4[%c0_6, %c0_7] : memref<1x512xf32, #tpu.memory_space<vmem>>, vector<1x512xf32>
    %8 = arith.mulf %3, %7 : vector<1x512xf32>
    %9 = arith.addf %6, %8 : vector<1x512xf32>
    %c0_8 = arith.constant 0 : index
    %c0_9 = arith.constant 0 : index
    %10 = vector.load %arg8[%c0_8, %c0_9] : memref<9x512xf32, #tpu.memory_space<vmem>>, vector<9x512xf32>
    %c17_i32 = arith.constant 17 : i32
    %11 = tpu.dynamic_rotate %9 by %c17_i32 dim 1 : vector<1x512xf32>, i32 -> vector<1x512xf32>
    %12 = vector.extract_strided_slice %10 {offsets = [0, 0], sizes = [1, 512], strides = [1, 1]} : vector<9x512xf32> to vector<1x512xf32>
    %13 = arith.mulf %11, %12 : vector<1x512xf32>
    %c0_10 = arith.constant 0 : index
    %c0_11 = arith.constant 0 : index
    %14 = vector.load %arg11[%c0_10, %c0_11] : memref<9x512xf32, #tpu.memory_space<vmem>>, vector<1x512xf32>
    tpu.vector_store %arg11[%c0_10, %c0_11], %13 {strides = array<i32>} : memref<9x512xf32, #tpu.memory_space<vmem>>, vector<1x512xf32>,
    %c16_i32 = arith.constant 16 : i32
    %15 = tpu.dynamic_rotate %9 by %c16_i32 dim 1 : vector<1x512xf32>, i32 -> vector<1x512xf32>
    %16 = vector.extract_strided_slice %10 {offsets = [1, 0], sizes = [1, 512], strides = [1, 1]} : vector<9x512xf32> to vector<1x512xf32>
    %17 = arith.mulf %15, %16 : vector<1x512xf32>
    %c1 = arith.constant 1 : index
    %c0_12 = arith.constant 0 : index
    %18 = vector.load %arg11[%c1, %c0_12] : memref<9x512xf32, #tpu.memory_space<vmem>>, vector<1x512xf32>
    tpu.vector_store %arg11[%c1, %c0_12], %17 {strides = array<i32>} : memref<9x512xf32, #tpu.memory_space<vmem>>, vector<1x512xf32>,
    %c15_i32 = arith.constant 15 : i32
    %19 = tpu.dynamic_rotate %9 by %c15_i32 dim 1 : vector<1x512xf32>, i32 -> vector<1x512xf32>
    %20 = vector.extract_strided_slice %10 {offsets = [2, 0], sizes = [1, 512], strides = [1, 1]} : vector<9x512xf32> to vector<1x512xf32>
    %21 = arith.mulf %19, %20 : vector<1x512xf32>
    %c2 = arith.constant 2 : index
    %c0_13 = arith.constant 0 : index
    %22 = vector.load %arg11[%c2, %c0_13] : memref<9x512xf32, #tpu.memory_space<vmem>>, vector<1x512xf32>
    tpu.vector_store %arg11[%c2, %c0_13], %21 {strides = array<i32>} : memref<9x512xf32, #tpu.memory_space<vmem>>, vector<1x512xf32>,
    %c1_i32 = arith.constant 1 : i32
    %23 = tpu.dynamic_rotate %9 by %c1_i32 dim 1 : vector<1x512xf32>, i32 -> vector<1x512xf32>
    %24 = vector.extract_strided_slice %10 {offsets = [3, 0], sizes = [1, 512], strides = [1, 1]} : vector<9x512xf32> to vector<1x512xf32>
    %25 = arith.mulf %23, %24 : vector<1x512xf32>
    %c3 = arith.constant 3 : index
    %c0_14 = arith.constant 0 : index
    %26 = vector.load %arg11[%c3, %c0_14] : memref<9x512xf32, #tpu.memory_space<vmem>>, vector<1x512xf32>
    tpu.vector_store %arg11[%c3, %c0_14], %25 {strides = array<i32>} : memref<9x512xf32, #tpu.memory_space<vmem>>, vector<1x512xf32>,
    %27 = vector.extract_strided_slice %10 {offsets = [4, 0], sizes = [1, 512], strides = [1, 1]} : vector<9x512xf32> to vector<1x512xf32>
    %28 = arith.mulf %9, %27 : vector<1x512xf32>
    %c4 = arith.constant 4 : index
    %c0_15 = arith.constant 0 : index
    %29 = vector.load %arg11[%c4, %c0_15] : memref<9x512xf32, #tpu.memory_space<vmem>>, vector<1x512xf32>
    tpu.vector_store %arg11[%c4, %c0_15], %28 {strides = array<i32>} : memref<9x512xf32, #tpu.memory_space<vmem>>, vector<1x512xf32>,
    %c511_i32 = arith.constant 511 : i32
    %30 = tpu.dynamic_rotate %9 by %c511_i32 dim 1 : vector<1x512xf32>, i32 -> vector<1x512xf32>
    %31 = vector.extract_strided_slice %10 {offsets = [5, 0], sizes = [1, 512], strides = [1, 1]} : vector<9x512xf32> to vector<1x512xf32>
    %32 = arith.mulf %30, %31 : vector<1x512xf32>
    %c5 = arith.constant 5 : index
    %c0_16 = arith.constant 0 : index
    %33 = vector.load %arg11[%c5, %c0_16] : memref<9x512xf32, #tpu.memory_space<vmem>>, vector<1x512xf32>
    tpu.vector_store %arg11[%c5, %c0_16], %32 {strides = array<i32>} : memref<9x512xf32, #tpu.memory_space<vmem>>, vector<1x512xf32>,
    %c497_i32 = arith.constant 497 : i32
    %34 = tpu.dynamic_rotate %9 by %c497_i32 dim 1 : vector<1x512xf32>, i32 -> vector<1x512xf32>
    %35 = vector.extract_strided_slice %10 {offsets = [6, 0], sizes = [1, 512], strides = [1, 1]} : vector<9x512xf32> to vector<1x512xf32>
    %36 = arith.mulf %34, %35 : vector<1x512xf32>
    %c6 = arith.constant 6 : index
    %c0_17 = arith.constant 0 : index
    %37 = vector.load %arg11[%c6, %c0_17] : memref<9x512xf32, #tpu.memory_space<vmem>>, vector<1x512xf32>
    tpu.vector_store %arg11[%c6, %c0_17], %36 {strides = array<i32>} : memref<9x512xf32, #tpu.memory_space<vmem>>, vector<1x512xf32>,
    %c496_i32 = arith.constant 496 : i32
    %38 = tpu.dynamic_rotate %9 by %c496_i32 dim 1 : vector<1x512xf32>, i32 -> vector<1x512xf32>
    %39 = vector.extract_strided_slice %10 {offsets = [7, 0], sizes = [1, 512], strides = [1, 1]} : vector<9x512xf32> to vector<1x512xf32>
    %40 = arith.mulf %38, %39 : vector<1x512xf32>
    %c7 = arith.constant 7 : index
    %c0_18 = arith.constant 0 : index
    %41 = vector.load %arg11[%c7, %c0_18] : memref<9x512xf32, #tpu.memory_space<vmem>>, vector<1x512xf32>
    tpu.vector_store %arg11[%c7, %c0_18], %40 {strides = array<i32>} : memref<9x512xf32, #tpu.memory_space<vmem>>, vector<1x512xf32>,
    %c495_i32 = arith.constant 495 : i32
    %42 = tpu.dynamic_rotate %9 by %c495_i32 dim 1 : vector<1x512xf32>, i32 -> vector<1x512xf32>
    %43 = vector.extract_strided_slice %10 {offsets = [8, 0], sizes = [1, 512], strides = [1, 1]} : vector<9x512xf32> to vector<1x512xf32>
    %44 = arith.mulf %42, %43 : vector<1x512xf32>
    %c8 = arith.constant 8 : index
    %c0_19 = arith.constant 0 : index
    %45 = vector.load %arg11[%c8, %c0_19] : memref<9x512xf32, #tpu.memory_space<vmem>>, vector<1x512xf32>
    tpu.vector_store %arg11[%c8, %c0_19], %44 {strides = array<i32>} : memref<9x512xf32, #tpu.memory_space<vmem>>, vector<1x512xf32>,
    %c0_20 = arith.constant 0 : index
    %c0_21 = arith.constant 0 : index
    %46 = vector.load %arg6[%c0_20, %c0_21] : memref<32x9xf32, #tpu.memory_space<vmem>>, vector<32x9xf32>
    %c0_22 = arith.constant 0 : index
    %c0_23 = arith.constant 0 : index
    %47 = vector.load %arg11[%c0_22, %c0_23] : memref<9x512xf32, #tpu.memory_space<vmem>>, vector<9x512xf32>
    %cst = arith.constant dense<0.000000e+00> : vector<32x512xf32>
    %48 = tpu.matmul %46, %47, %cst {dimension_numbers = #tpu.dot_dimension_numbers<[1], [0], [0], [1], [0, 0, 1, 1], [], []>} : vector<32x9xf32>, vector<9x512xf32>, vector<32x512xf32> -> vector<32x512xf32>
    %c0_24 = arith.constant 0 : index
    %c0_25 = arith.constant 0 : index
    %49 = vector.load %arg5[%c0_24, %c0_25] : memref<32x512xf32, #tpu.memory_space<vmem>>, vector<32x512xf32>
    %50 = arith.addf %48, %49 : vector<32x512xf32>
    %cst_26 = arith.constant 0.000000e+00 : f32
    %51 = vector.broadcast %cst_26 : f32 to vector<32x512xf32>
    %52 = arith.maximumf %50, %51 : vector<32x512xf32>
    %c0_27 = arith.constant 0 : index
    %c0_28 = arith.constant 0 : index
    %53 = vector.load %arg7[%c0_27, %c0_28] : memref<9x32xf32, #tpu.memory_space<vmem>>, vector<9x32xf32>
    %cst_29 = arith.constant dense<0.000000e+00> : vector<9x512xf32>
    %54 = tpu.matmul %53, %52, %cst_29 {dimension_numbers = #tpu.dot_dimension_numbers<[1], [0], [0], [1], [0, 0, 1, 1], [], []>} : vector<9x32xf32>, vector<32x512xf32>, vector<9x512xf32> -> vector<9x512xf32>
    %cst_30 = arith.constant 0.000000e+00 : f32
    %55 = vector.broadcast %cst_30 : f32 to vector<1x512xf32>
    %56 = vector.extract_strided_slice %54 {offsets = [0, 0], sizes = [1, 512], strides = [1, 1]} : vector<9x512xf32> to vector<1x512xf32>
    %c17_i32_31 = arith.constant 17 : i32
    %57 = tpu.dynamic_rotate %56 by %c17_i32_31 dim 1 : vector<1x512xf32>, i32 -> vector<1x512xf32>
    %58 = vector.extract_strided_slice %10 {offsets = [0, 0], sizes = [1, 512], strides = [1, 1]} : vector<9x512xf32> to vector<1x512xf32>
    %59 = arith.mulf %57, %58 : vector<1x512xf32>
    %60 = arith.addf %55, %59 : vector<1x512xf32>
    %61 = vector.extract_strided_slice %54 {offsets = [1, 0], sizes = [1, 512], strides = [1, 1]} : vector<9x512xf32> to vector<1x512xf32>
    %c16_i32_32 = arith.constant 16 : i32
    %62 = tpu.dynamic_rotate %61 by %c16_i32_32 dim 1 : vector<1x512xf32>, i32 -> vector<1x512xf32>
    %63 = vector.extract_strided_slice %10 {offsets = [1, 0], sizes = [1, 512], strides = [1, 1]} : vector<9x512xf32> to vector<1x512xf32>
    %64 = arith.mulf %62, %63 : vector<1x512xf32>
    %65 = arith.addf %60, %64 : vector<1x512xf32>
    %66 = vector.extract_strided_slice %54 {offsets = [2, 0], sizes = [1, 512], strides = [1, 1]} : vector<9x512xf32> to vector<1x512xf32>
    %c15_i32_33 = arith.constant 15 : i32
    %67 = tpu.dynamic_rotate %66 by %c15_i32_33 dim 1 : vector<1x512xf32>, i32 -> vector<1x512xf32>
    %68 = vector.extract_strided_slice %10 {offsets = [2, 0], sizes = [1, 512], strides = [1, 1]} : vector<9x512xf32> to vector<1x512xf32>
    %69 = arith.mulf %67, %68 : vector<1x512xf32>
    %70 = arith.addf %65, %69 : vector<1x512xf32>
    %71 = vector.extract_strided_slice %54 {offsets = [3, 0], sizes = [1, 512], strides = [1, 1]} : vector<9x512xf32> to vector<1x512xf32>
    %c1_i32_34 = arith.constant 1 : i32
    %72 = tpu.dynamic_rotate %71 by %c1_i32_34 dim 1 : vector<1x512xf32>, i32 -> vector<1x512xf32>
    %73 = vector.extract_strided_slice %10 {offsets = [3, 0], sizes = [1, 512], strides = [1, 1]} : vector<9x512xf32> to vector<1x512xf32>
    %74 = arith.mulf %72, %73 : vector<1x512xf32>
    %75 = arith.addf %70, %74 : vector<1x512xf32>
    %76 = vector.extract_strided_slice %54 {offsets = [4, 0], sizes = [1, 512], strides = [1, 1]} : vector<9x512xf32> to vector<1x512xf32>
    %77 = vector.extract_strided_slice %10 {offsets = [4, 0], sizes = [1, 512], strides = [1, 1]} : vector<9x512xf32> to vector<1x512xf32>
    %78 = arith.mulf %76, %77 : vector<1x512xf32>
    %79 = arith.addf %75, %78 : vector<1x512xf32>
    %80 = vector.extract_strided_slice %54 {offsets = [5, 0], sizes = [1, 512], strides = [1, 1]} : vector<9x512xf32> to vector<1x512xf32>
    %c511_i32_35 = arith.constant 511 : i32
    %81 = tpu.dynamic_rotate %80 by %c511_i32_35 dim 1 : vector<1x512xf32>, i32 -> vector<1x512xf32>
    %82 = vector.extract_strided_slice %10 {offsets = [5, 0], sizes = [1, 512], strides = [1, 1]} : vector<9x512xf32> to vector<1x512xf32>
    %83 = arith.mulf %81, %82 : vector<1x512xf32>
    %84 = arith.addf %79, %83 : vector<1x512xf32>
    %85 = vector.extract_strided_slice %54 {offsets = [6, 0], sizes = [1, 512], strides = [1, 1]} : vector<9x512xf32> to vector<1x512xf32>
    %c497_i32_36 = arith.constant 497 : i32
    %86 = tpu.dynamic_rotate %85 by %c497_i32_36 dim 1 : vector<1x512xf32>, i32 -> vector<1x512xf32>
    %87 = vector.extract_strided_slice %10 {offsets = [6, 0], sizes = [1, 512], strides = [1, 1]} : vector<9x512xf32> to vector<1x512xf32>
    %88 = arith.mulf %86, %87 : vector<1x512xf32>
    %89 = arith.addf %84, %88 : vector<1x512xf32>
    %90 = vector.extract_strided_slice %54 {offsets = [7, 0], sizes = [1, 512], strides = [1, 1]} : vector<9x512xf32> to vector<1x512xf32>
    %c496_i32_37 = arith.constant 496 : i32
    %91 = tpu.dynamic_rotate %90 by %c496_i32_37 dim 1 : vector<1x512xf32>, i32 -> vector<1x512xf32>
    %92 = vector.extract_strided_slice %10 {offsets = [7, 0], sizes = [1, 512], strides = [1, 1]} : vector<9x512xf32> to vector<1x512xf32>
    %93 = arith.mulf %91, %92 : vector<1x512xf32>
    %94 = arith.addf %89, %93 : vector<1x512xf32>
    %95 = vector.extract_strided_slice %54 {offsets = [8, 0], sizes = [1, 512], strides = [1, 1]} : vector<9x512xf32> to vector<1x512xf32>
    %c495_i32_38 = arith.constant 495 : i32
    %96 = tpu.dynamic_rotate %95 by %c495_i32_38 dim 1 : vector<1x512xf32>, i32 -> vector<1x512xf32>
    %97 = vector.extract_strided_slice %10 {offsets = [8, 0], sizes = [1, 512], strides = [1, 1]} : vector<9x512xf32> to vector<1x512xf32>
    %98 = arith.mulf %96, %97 : vector<1x512xf32>
    %99 = arith.addf %94, %98 : vector<1x512xf32>
    %c0_39 = arith.constant 0 : index
    %c0_40 = arith.constant 0 : index
    %100 = memref.load %arg9[%c0_39, %c0_40] : memref<1x1xf32, #tpu.memory_space<smem>>
    %101 = vector.broadcast %100 : f32 to vector<1x512xf32>
    %102 = arith.addf %99, %101 : vector<1x512xf32>
    %103 = arith.subf %3, %102 : vector<1x512xf32>
    %c0_41 = arith.constant 0 : index
    %c0_42 = arith.constant 0 : index
    %104 = memref.load %arg10[%c0_41, %c0_42] : memref<1x1xf32, #tpu.memory_space<smem>>
    %105 = arith.mulf %103, %103 : vector<1x512xf32>
    %106 = vector.shape_cast %105 : vector<1x512xf32> to vector<1x1x512xf32>
    %cst_43 = arith.constant dense<0.000000e+00> : vector<1xf32>
    %107 = vector.multi_reduction <add>, %106, %cst_43 [1, 2] : vector<1x1x512xf32> to vector<1xf32>
    %108 = vector.shape_cast %107 : vector<1xf32> to vector<1x1x1xf32>
    %109 = vector.extract %108[0, 0, 0] : f32 from vector<1x1x1xf32>
    %110 = arith.addf %104, %109 : f32
    %c0_44 = arith.constant 0 : index
    %c0_45 = arith.constant 0 : index
    %111 = memref.load %arg10[%c0_44, %c0_45] : memref<1x1xf32, #tpu.memory_space<smem>>
    memref.store %110, %arg10[%c0_44, %c0_45] : memref<1x1xf32, #tpu.memory_space<smem>>
    %c0_i32_46 = arith.constant 0 : i32
    %112 = arith.cmpi eq, %arg0, %c0_i32_46 : i32
    %113 = arith.extui %112 : i1 to i32
    %c0_i32_47 = arith.constant 0 : i32
    %114 = arith.cmpi ne, %113, %c0_i32_47 : i32
    scf.if %114 {
      %c0_48 = arith.constant 0 : index
      %c0_49 = arith.constant 0 : index
      %115 = memref.load %arg10[%c0_48, %c0_49] : memref<1x1xf32, #tpu.memory_space<smem>>
      %cst_50 = arith.constant 0.001953125 : f32
      %116 = arith.mulf %115, %cst_50 : f32
      %c0_51 = arith.constant 0 : index
      %c0_52 = arith.constant 0 : index
      %117 = memref.load %arg10[%c0_51, %c0_52] : memref<1x1xf32, #tpu.memory_space<smem>>
      memref.store %116, %arg10[%c0_51, %c0_52] : memref<1x1xf32, #tpu.memory_space<smem>>
    } else {
    }
    return
  }
  func.func @transform_0(%arg0: i32) -> (i32, i32) {
    %c0_i32 = arith.constant 0 : i32
    %c0_i32_0 = arith.constant 0 : i32
    return %c0_i32, %arg0 : i32, i32
  }
  func.func @transform_1(%arg0: i32) -> (i32, i32) {
    %c0_i32 = arith.constant 0 : i32
    %c0_i32_0 = arith.constant 0 : i32
    return %c0_i32, %arg0 : i32, i32
  }
  func.func @transform_2(%arg0: i32) -> (i32, i32) {
    %c0_i32 = arith.constant 0 : i32
    %c0_i32_0 = arith.constant 0 : i32
    return %c0_i32, %arg0 : i32, i32
  }
  func.func @transform_3(%arg0: i32) -> (i32, i32) {
    %c0_i32 = arith.constant 0 : i32
    %c0_i32_0 = arith.constant 0 : i32
    return %c0_i32, %arg0 : i32, i32
  }
  func.func @transform_4(%arg0: i32) -> (i32, i32) {
    %c0_i32 = arith.constant 0 : i32
    %c0_i32_0 = arith.constant 0 : i32
    return %c0_i32, %arg0 : i32, i32
  }
  func.func @transform_5(%arg0: i32) -> (i32, i32) {
    %c0_i32 = arith.constant 0 : i32
    %c0_i32_0 = arith.constant 0 : i32
    %c0_i32_1 = arith.constant 0 : i32
    return %c0_i32, %c0_i32_0 : i32, i32
  }
  func.func @transform_6(%arg0: i32) -> (i32, i32) {
    %c0_i32 = arith.constant 0 : i32
    %c0_i32_0 = arith.constant 0 : i32
    %c0_i32_1 = arith.constant 0 : i32
    return %c0_i32, %c0_i32_0 : i32, i32
  }
  func.func @transform_7(%arg0: i32) -> (i32, i32) {
    %c0_i32 = arith.constant 0 : i32
    %c0_i32_0 = arith.constant 0 : i32
    %c0_i32_1 = arith.constant 0 : i32
    return %c0_i32, %c0_i32_0 : i32, i32
  }
  func.func @transform_8(%arg0: i32) -> (i32, i32) {
    %c0_i32 = arith.constant 0 : i32
    %c0_i32_0 = arith.constant 0 : i32
    %c0_i32_1 = arith.constant 0 : i32
    return %c0_i32, %c0_i32_0 : i32, i32
  }
  func.func @transform_9(%arg0: i32) -> (i32, i32) {
    %c0_i32 = arith.constant 0 : i32
    %c0_i32_0 = arith.constant 0 : i32
    %c0_i32_1 = arith.constant 0 : i32
    return %c0_i32, %c0_i32_0 : i32, i32
  }
}

</mosaic_0001>

<bundles_post_ra>
// kernel: _lambda_.1
= control target key start
LH: loop header
LB: loop body
LE: loop exit
PB: predicated region body
PF: predicated region fallthrough
CT: control target
= control target key end

     0   :  { %v56_v3 = vlaneseq  ;;  %s2074_s0 = inlined_call_operand.vmem [shape: f32[1,512], index: 0, kind: input, shape index: {}]   ;;  %s2075_s1 = inlined_call_operand.vmem [shape: f32[1,512], index: 1, kind: input, shape index: {}]   ;;  %s2076_s2 = inlined_call_operand.vmem [shape: f32[1,512], index: 2, kind: input, shape index: {}]   ;;  %s2077_s3 = inlined_call_operand.vmem [shape: f32[1,512], index: 3, kind: input, shape index: {}]   ;;  %s2078_s4 = inlined_call_operand.vmem [shape: f32[32,512], index: 4, kind: input, shape index: {}]   ;;  %s2079_s5 = inlined_call_operand.vmem [shape: f32[32,9], index: 5, kind: input, shape index: {}]   ;;  %s2080_s6 = inlined_call_operand.vmem [shape: f32[9,32], index: 6, kind: input, shape index: {}]   ;;  %s2081_s7 = inlined_call_operand.vmem [shape: f32[9,512], index: 7, kind: input, shape index: {}]   ;;  %s2082_s8 = inlined_call_operand.<no memory space> [shape: f32[1,1], index: 8, kind: input, shape index: {}]   ;;  %s2083_s9 = inlined_call_operand.hbm [shape: f32[1,1], index: 9, kind: output, shape index: {}]  }
   0x1   :  { %v40_v0 = vld [vmem:[%s2075_s1] sm:$0xf] }
   0x2   :  { %v41_v1 = vld [vmem:[%s2074_s0] sm:$0xf]  ;;  %v1441_v7 = vshrl.u32 %v56_v3, 7 }
   0x3   :  { %v42_v2 = vld [vmem:[%s2076_s2] sm:$0xf] }
   0x4   :  { %v43_v4 = vmul.f32 %v42_v2, %v41_v1  ;;  %v44_v5 = vld [vmem:[%s2077_s3] sm:$0xf]  ;;  %v2085_v9 = vsub.s32 2, %v1441_v7  ;;  %v2087_v10 = vsub.s32 0, %v1441_v7 }
   0x5   :  { %v45_v6 = vmul.f32 %v44_v5, %v40_v0 }
   0x7   :  { %v46_v8 = vadd.f32 %v45_v6, %v43_v4 }
   0x8   :  { %15 = vsyncpa [#allocation5], 0  ;;  %v2084_v11 = vsub.s32 3, %v1441_v7  ;;  %v2086_v12 = vsub.s32 1, %v1441_v7  ;;  %s1366_s0 = smov 17   ;;  %s1367_s2 = smov 16  }
   0x9   :  { %v67_v13 = vrot.slane %v46_v8, %v2085_v9  ;;  %v59_v14 = vrot.slane %v46_v8, %v2087_v10  ;;  %s1368_s3 = smov 15   ;;  %s1369_s17 = smov 1   ;;  %v1370_v17 = vmov 1966171168   ;;  %v1478_v20 = vld [vmem:[%s2081_s7] sm:$0xff]  ;;  %v1483_v21 = vld [vmem:[%s2081_s7 + $0x18] sm:$0xff] }
   0xa   :  { %v71_v15 = vrot.slane %v46_v8, %v2084_v11  ;;  %v63_v16 = vrot.slane %v46_v8, %v2086_v12  ;;  %v102_v18 = vunpack.c.l.s4 %v1370_v17  ;;  %s1371_s18 = smov 127   ;;  %v1488_v22 = vld [vmem:[%s2081_s7 + $0x8] sm:$0xff]  ;;  %v1493_v23 = vld [vmem:[%s2081_s7 + $0x10] sm:$0xff]  ;;  %s1372_s27 = smov 113   ;;  %vm1512_vm0 = vcmp.lt.s32.totalorder %v56_v3, 512 }
   0xb   :  { %80 = vrot.lane.b32.xlu1 %v67_v13, %s1366_s0  ;;  %76 = vrot.lane.b32.xlu0 %v59_v14, %s1366_s0  ;;  %v305_v25 = vcombine.high %v1478_v20, %v1488_v22  ;;  %v306_v26 = vcombine.high %v1493_v23, %v1483_v21  ;;  %s1373_s28 = smov 112   ;;  %s1374_s29 = smov 111   ;;  %v1375_v33 = vmov 0.0   ;;  %v1527_v34 = vand.u32 127, %v56_v3 }
   0xc   :  { %v103_v19 = vunpack.c.0.s8 %v102_v18  ;;  %672 = vmatprep.mubr.f32.mxu0 %v1375_v33  ;;  %761 = vmatprep.mubr.f32.mxu1 %v1375_v33  ;;  %v148_v51 = vrot.slane %v1488_v22, 1  ;;  %v147_v52 = vrot.slane %v1478_v20, 1  ;;  %v149_v53 = vrot.slane %v1493_v23, 1 }
   0xd   :  { %vm86_vm1 = vcmp.lt.s32.totalorder %v1527_v34, 17  ;;  %vm138_vm2 = vcmp.lt.s32.totalorder %v1527_v34, 16  ;;  %v150_v57 = vrot.slane %v1483_v21, 1  ;;  %vm199_vm3 = vcmp.lt.s32.totalorder %v1527_v34, 15 }
   0xe   :  { %v1496_v24 = vsub.s32 %v103_v19, %v1441_v7  ;;  %vm256_vm4 = vcmp.lt.s32.totalorder %v1527_v34, 1  ;;  %vm342_vm5 = vcmp.lt.s32.totalorder %v1527_v34, 127  ;;  %vm399_vm6 = vcmp.lt.s32.totalorder %v1527_v34, 113 }
   0xf   :  { %82 = vrot.lane.b32.xlu1 %v71_v15, %s1366_s0  ;;  %78 = vrot.lane.b32.xlu0 %v63_v16, %s1366_s0  ;;  %vm456_vm7 = vcmp.lt.s32.totalorder %v1527_v34, 112  ;;  %vm513_vm8 = vcmp.lt.s32.totalorder %v1527_v34, 111  ;;  %vm595_vm9 = vcmask 1040384   ;;  %vm1376_vm10 = vmmov 1  }
  0x10   :  { %v313_v27 = vrot.slane %v305_v25, %v1496_v24  ;;  %v320_v28 = vrot.slane %v306_v26, %v1496_v24  ;;  %v207_v25 = vrot.slane %v1483_v21, 2  ;;  %vm1742_vm11 = vmpackc.low %vm595_vm9, %vm1376_vm10  ;;  %vm582_vm12 = vcmask 72704  }
  0x11   :  { %vm804_vm13 = vcmask 261120  }
  0x12   :  { %v321_v29 = vcombine.low %v313_v27, %v320_v28 }
  0x13   :  { %132 = vrot.lane.b32.xlu1 %v63_v16, %s1367_s2  ;;  %130 = vrot.lane.b32.xlu0 %v59_v14, %s1367_s2 }
  0x14   :  { %v328_v30 = vrot.slane %v321_v29, %v1496_v24 }
  0x16   :  { %v330_v31 = vmul.f32 %v328_v30, %v46_v8 }
  0x17   :  { %136 = vrot.lane.b32.xlu1 %v71_v15, %s1367_s2  ;;  %134 = vrot.lane.b32.xlu0 %v67_v13, %s1367_s2 }
  0x18   :  { %332 = vst.msk [vmem:[#allocation2 + $0x4] ss:$8 sm:$0xf] %vm1512_vm0, %v330_v31 }
  0x1b   :  { %193 = vrot.lane.b32.xlu1 %v63_v16, %s1368_s3  ;;  %191 = vrot.lane.b32.xlu0 %v59_v14, %s1368_s3 }
  0x1f   :  { %197 = vrot.lane.b32.xlu1 %v71_v15, %s1368_s3  ;;  %195 = vrot.lane.b32.xlu0 %v67_v13, %s1368_s3 }
  0x23   :  { %250 = vrot.lane.b32.xlu1 %v63_v16, %s1369_s17  ;;  %248 = vrot.lane.b32.xlu0 %v59_v14, %s1369_s17 }
  0x27   :  { %254 = vrot.lane.b32.xlu1 %v71_v15, %s1369_s17  ;;  %252 = vrot.lane.b32.xlu0 %v67_v13, %s1369_s17 }
  0x2b   :  { %336 = vrot.lane.b32.xlu1 %v63_v16, %s1371_s18  ;;  %334 = vrot.lane.b32.xlu0 %v59_v14, %s1371_s18 }
  0x2f   :  { %340 = vrot.lane.b32.xlu1 %v71_v15, %s1371_s18  ;;  %338 = vrot.lane.b32.xlu0 %v67_v13, %s1371_s18 }
  0x33   :  { %393 = vrot.lane.b32.xlu1 %v63_v16, %s1372_s27  ;;  %391 = vrot.lane.b32.xlu0 %v59_v14, %s1372_s27 }
  0x37   :  { %397 = vrot.lane.b32.xlu1 %v71_v15, %s1372_s27  ;;  %395 = vrot.lane.b32.xlu0 %v67_v13, %s1372_s27 }
  0x3b   :  { %450 = vrot.lane.b32.xlu1 %v63_v16, %s1373_s28  ;;  %448 = vrot.lane.b32.xlu0 %v59_v14, %s1373_s28 }
  0x3f   :  { %454 = vrot.lane.b32.xlu1 %v71_v15, %s1373_s28  ;;  %452 = vrot.lane.b32.xlu0 %v67_v13, %s1373_s28 }
  0x43   :  { %507 = vrot.lane.b32.xlu1 %v63_v16, %s1374_s29  ;;  %505 = vrot.lane.b32.xlu0 %v59_v14, %s1374_s29  ;;  %v205_v14 = vrot.slane %v1488_v22, 2  ;;  %v206_v16 = vrot.slane %v1493_v23, 2 }
  0x47   :  { %511 = vrot.lane.b32.xlu1 %v71_v15, %s1374_s29  ;;  %509 = vrot.lane.b32.xlu0 %v67_v13, %s1374_s29  ;;  %v204_v15 = vrot.slane %v1478_v20, 2 }
  0x7d   :  { %v81_v35 = vpop.permute.xlu1 %80  ;;  %v77_v36 = vpop.permute.xlu0 %76 }
  0x81   :  { %v83_v37 = vpop.permute.xlu1 %82  ;;  %v79_v38 = vpop.permute.xlu0 %78 }
  0x82   :  { %v87_v39 = vsel %vm86_vm1, %v81_v35, %v83_v37  ;;  %v90_v40 = vsel %vm86_vm1, %v83_v37, %v77_v36  ;;  %v88_v41 = vsel %vm86_vm1, %v79_v38, %v81_v35  ;;  %v89_v42 = vsel %vm86_vm1, %v77_v36, %v79_v38 }
  0x83   :  { %v91_v43 = vmul.f32 %v90_v40, %v1478_v20  ;;  %v94_v44 = vmul.f32 %v87_v39, %v1483_v21  ;;  %v92_v45 = vmul.f32 %v89_v42, %v1488_v22  ;;  %v93_v46 = vmul.f32 %v88_v41, %v1493_v23 }
  0x85   :  { %v99_v47 = vcombine.low %v91_v43, %v92_v45  ;;  %v100_v48 = vcombine.low %v93_v46, %v94_v44  ;;  %v133_v49 = vpop.permute.xlu1 %132  ;;  %v131_v50 = vpop.permute.xlu0 %130  ;;  %v262_v44 = vrot.slane %v1488_v22, 3  ;;  %v261_v45 = vrot.slane %v1478_v20, 3 }
  0x86   :  { %v141_v56 = vsel %vm138_vm2, %v131_v50, %v133_v49  ;;  %v263_v46 = vrot.slane %v1493_v23, 3 }
  0x87   :  { %v107_v54 = vrot.slane %v99_v47, %v1496_v24  ;;  %v114_v55 = vrot.slane %v100_v48, %v1496_v24  ;;  %v156_v61 = vmul.f32 %v148_v51, %v141_v56 }
  0x89   :  { %v115_v58 = vcombine.low %v107_v54, %v114_v55  ;;  %v137_v59 = vpop.permute.xlu1 %136  ;;  %v135_v60 = vpop.permute.xlu0 %134 }
  0x8a   :  { %v142_v62 = vsel %vm138_vm2, %v137_v59, %v131_v50  ;;  %v139_v63 = vsel %vm138_vm2, %v135_v60, %v137_v59  ;;  %v140_v0 = vsel %vm138_vm2, %v133_v49, %v135_v60  ;;  %v264_v50 = vrot.slane %v1483_v21, 3 }
  0x8b   :  { %v122_v1 = vrot.slane %v115_v58, %v1496_v24  ;;  %v155_v2 = vmul.f32 %v147_v52, %v142_v62  ;;  %v157_v3 = vmul.f32 %v149_v53, %v140_v0  ;;  %v158_v4 = vmul.f32 %v150_v57, %v139_v63 }
  0x8d   :  { %128 = vst.msk [vmem:[#allocation2] ss:$8 sm:$0xf] %vm1512_vm0, %v122_v1  ;;  %v163_v5 = vcombine.low %v155_v2, %v156_v61  ;;  %v164_v6 = vcombine.low %v157_v3, %v158_v4  ;;  %v194_v8 = vpop.permute.xlu1 %193  ;;  %v192_v13 = vpop.permute.xlu0 %191 }
  0x8e   :  { %v202_v19 = vsel %vm199_vm3, %v192_v13, %v194_v8 }
  0x8f   :  { %v171_v17 = vrot.slane %v163_v5, %v1496_v24  ;;  %v178_v18 = vrot.slane %v164_v6, %v1496_v24  ;;  %v213_v29 = vmul.f32 %v205_v14, %v202_v19  ;;  %v347_v6 = vrot.slane %v1478_v20, 5 }
  0x91   :  { %v179_v26 = vcombine.low %v171_v17, %v178_v18  ;;  %v198_v27 = vpop.permute.xlu1 %197  ;;  %v196_v28 = vpop.permute.xlu0 %195 }
  0x92   :  { %v203_v30 = vsel %vm199_vm3, %v198_v27, %v192_v13  ;;  %v200_v31 = vsel %vm199_vm3, %v196_v28, %v198_v27  ;;  %v201_v35 = vsel %vm199_vm3, %v194_v8, %v196_v28  ;;  %v350_v8 = vrot.slane %v1483_v21, 5 }
  0x93   :  { %v186_v36 = vrot.slane %v179_v26, %v1496_v24  ;;  %v212_v37 = vmul.f32 %v204_v15, %v203_v30  ;;  %v214_v38 = vmul.f32 %v206_v16, %v201_v35  ;;  %v215_v39 = vmul.f32 %v207_v25, %v200_v31 }
  0x94   :  { %v348_v13 = vrot.slane %v1488_v22, 5  ;;  %v349_v26 = vrot.slane %v1493_v23, 5 }
  0x95   :  { %189 = vst.msk [vmem:[#allocation2 + $0x1] ss:$8 sm:$0xf] %vm1512_vm0, %v186_v36  ;;  %v220_v40 = vcombine.low %v212_v37, %v213_v29  ;;  %v221_v41 = vcombine.low %v214_v38, %v215_v39  ;;  %v251_v42 = vpop.permute.xlu1 %250  ;;  %v249_v43 = vpop.permute.xlu0 %248 }
  0x96   :  { %v259_v49 = vsel %vm256_vm4, %v249_v43, %v251_v42 }
  0x97   :  { %v228_v47 = vrot.slane %v220_v40, %v1496_v24  ;;  %v235_v48 = vrot.slane %v221_v41, %v1496_v24  ;;  %v270_v58 = vmul.f32 %v262_v44, %v259_v49  ;;  %v2091_v49 = vrot.slane %v1483_v21, 6 }
  0x99   :  { %v236_v54 = vcombine.low %v228_v47, %v235_v48  ;;  %v255_v55 = vpop.permute.xlu1 %254  ;;  %v253_v56 = vpop.permute.xlu0 %252  ;;  %v404_v48 = vrot.slane %v1478_v20, 6 }
  0x9a   :  { %v260_v59 = vsel %vm256_vm4, %v255_v55, %v249_v43  ;;  %v257_v60 = vsel %vm256_vm4, %v253_v56, %v255_v55  ;;  %v258_v61 = vsel %vm256_vm4, %v251_v42, %v253_v56 }
  0x9b   :  { %v243_v62 = vrot.slane %v236_v54, %v1496_v24  ;;  %v269_v63 = vmul.f32 %v261_v45, %v260_v59  ;;  %v271_v0 = vmul.f32 %v263_v46, %v258_v61  ;;  %v272_v1 = vmul.f32 %v264_v50, %v257_v60 }
  0x9c   :  { %v405_v54 = vrot.slane %v1488_v22, 6  ;;  %v2092_v59 = vrot.slane %v1493_v23, 6 }
  0x9d   :  { %246 = vst.msk [vmem:[#allocation2 + $0x2] ss:$8 sm:$0xf] %vm1512_vm0, %v243_v62  ;;  %v277_v2 = vcombine.low %v269_v63, %v270_v58  ;;  %v278_v3 = vcombine.low %v271_v0, %v272_v1  ;;  %v337_v4 = vpop.permute.xlu1 %336  ;;  %v335_v5 = vpop.permute.xlu0 %334 }
  0x9e   :  { %v345_v19 = vsel %vm342_vm5, %v335_v5, %v337_v4 }
  0x9f   :  { %v285_v17 = vrot.slane %v277_v2, %v1496_v24  ;;  %v292_v18 = vrot.slane %v278_v3, %v1496_v24  ;;  %v355_v30 = vmul.f32 %v347_v6, %v345_v19 }
  0xa1   :  { %v293_v27 = vcombine.low %v285_v17, %v292_v18  ;;  %v341_v28 = vpop.permute.xlu1 %340  ;;  %v339_v29 = vpop.permute.xlu0 %338 }
  0xa2   :  { %v346_v31 = vsel %vm342_vm5, %v341_v28, %v335_v5  ;;  %v343_v35 = vsel %vm342_vm5, %v339_v29, %v341_v28  ;;  %v344_v36 = vsel %vm342_vm5, %v337_v4, %v339_v29  ;;  %v461_v29 = vrot.slane %v1478_v20, 7 }
  0xa3   :  { %v300_v37 = vrot.slane %v293_v27, %v1496_v24  ;;  %v358_v38 = vmul.f32 %v350_v8, %v346_v31  ;;  %v356_v39 = vmul.f32 %v348_v13, %v344_v36  ;;  %v357_v40 = vmul.f32 %v349_v26, %v343_v35 }
  0xa4   :  { %v2090_v31 = vrot.slane %v1488_v22, 7 }
  0xa5   :  { %303 = vst.msk [vmem:[#allocation2 + $0x3] ss:$8 sm:$0xf] %vm1512_vm0, %v300_v37  ;;  %v363_v41 = vcombine.low %v355_v30, %v356_v39  ;;  %v364_v42 = vcombine.low %v357_v40, %v358_v38  ;;  %v394_v43 = vpop.permute.xlu1 %393  ;;  %v392_v47 = vpop.permute.xlu0 %391  ;;  %v2088_v30 = vrot.slane %v1483_v21, 7  ;;  %v2089_v38 = vrot.slane %v1493_v23, 7 }
  0xa6   :  { %v402_v58 = vsel %vm399_vm6, %v392_v47, %v394_v43 }
  0xa7   :  { %v371_v55 = vrot.slane %v363_v41, %v1496_v24  ;;  %v378_v56 = vrot.slane %v364_v42, %v1496_v24  ;;  %v412_v63 = vmul.f32 %v404_v48, %v402_v58 }
  0xa9   :  { %v379_v60 = vcombine.low %v371_v55, %v378_v56  ;;  %v398_v61 = vpop.permute.xlu1 %397  ;;  %v396_v62 = vpop.permute.xlu0 %395 }
  0xaa   :  { %v403_v0 = vsel %vm399_vm6, %v398_v61, %v392_v47  ;;  %v400_v1 = vsel %vm399_vm6, %v396_v62, %v398_v61  ;;  %v401_v2 = vsel %vm399_vm6, %v394_v43, %v396_v62 }
  0xab   :  { %v386_v3 = vrot.slane %v379_v60, %v1496_v24  ;;  %v415_v4 = vmul.f32 %v2091_v49, %v403_v0  ;;  %v413_v5 = vmul.f32 %v405_v54, %v401_v2  ;;  %v414_v17 = vmul.f32 %v2092_v59, %v400_v1 }
  0xad   :  { %389 = vst.msk [vmem:[#allocation2 + $0x5] ss:$8 sm:$0xf] %vm1512_vm0, %v386_v3  ;;  %v420_v18 = vcombine.low %v412_v63, %v413_v5  ;;  %v421_v19 = vcombine.low %v414_v17, %v415_v4  ;;  %v451_v27 = vpop.permute.xlu1 %450  ;;  %v449_v28 = vpop.permute.xlu0 %448  ;;  %v1704_v4 = vld [vmem:[%s2081_s7 + $0x20] sm:$0x1] }
  0xae   :  { %v459_v37 = vsel %vm456_vm7, %v449_v28, %v451_v27  ;;  %v1711_v17 = vld [vmem:[%s2081_s7 + $0x38] sm:$0x1] }
  0xaf   :  { %v428_v35 = vrot.slane %v420_v18, %v1496_v24  ;;  %v435_v36 = vrot.slane %v421_v19, %v1496_v24  ;;  %v469_v42 = vmul.f32 %v461_v29, %v459_v37  ;;  %v1716_v18 = vld [vmem:[%s2081_s7 + $0x28] sm:$0x1]  ;;  %v1721_v19 = vld [vmem:[%s2081_s7 + $0x30] sm:$0x1] }
  0xb1   :  { %v436_v39 = vcombine.low %v428_v35, %v435_v36  ;;  %v455_v40 = vpop.permute.xlu1 %454  ;;  %v453_v41 = vpop.permute.xlu0 %452 }
  0xb2   :  { %v460_v43 = vsel %vm456_vm7, %v455_v40, %v449_v28  ;;  %v457_v47 = vsel %vm456_vm7, %v453_v41, %v455_v40  ;;  %v458_v55 = vsel %vm456_vm7, %v451_v27, %v453_v41 }
  0xb3   :  { %v443_v56 = vrot.slane %v436_v39, %v1496_v24  ;;  %v472_v58 = vmul.f32 %v2088_v30, %v460_v43  ;;  %v470_v60 = vmul.f32 %v2090_v31, %v458_v55  ;;  %v471_v61 = vmul.f32 %v2089_v38, %v457_v47 }
  0xb5   :  { %446 = vst.msk [vmem:[#allocation2 + $0x6] ss:$8 sm:$0xf] %vm1512_vm0, %v443_v56  ;;  %v477_v62 = vcombine.low %v469_v42, %v470_v60  ;;  %v478_v63 = vcombine.low %v471_v61, %v472_v58  ;;  %v508_v0 = vpop.permute.xlu1 %507  ;;  %v506_v1 = vpop.permute.xlu0 %505 }
  0xb6   :  { %v516_v5 = vsel %vm513_vm8, %v506_v1, %v508_v0 }
  0xb7   :  { %v485_v2 = vrot.slane %v477_v62, %v1496_v24  ;;  %v492_v3 = vrot.slane %v478_v63, %v1496_v24  ;;  %v518_v36 = vmul.f32 %v516_v5, %v1704_v4 }
  0xb9   :  { %v493_v27 = vcombine.low %v485_v2, %v492_v3  ;;  %v512_v28 = vpop.permute.xlu1 %511  ;;  %v510_v35 = vpop.permute.xlu0 %509 }
  0xba   :  { %v517_v37 = vsel %vm513_vm8, %v512_v28, %v506_v1  ;;  %v514_v39 = vsel %vm513_vm8, %v510_v35, %v512_v28  ;;  %v515_v40 = vsel %vm513_vm8, %v508_v0, %v510_v35 }
  0xbb   :  { %v500_v41 = vrot.slane %v493_v27, %v1496_v24  ;;  %v521_v42 = vmul.f32 %v517_v37, %v1711_v17  ;;  %v519_v43 = vmul.f32 %v515_v40, %v1716_v18  ;;  %v520_v47 = vmul.f32 %v514_v39, %v1721_v19  ;;  %v554_v40 = vld [vmem:[%s2079_s5] sm:$0xff] }
  0xbd   :  { %503 = vst.msk [vmem:[#allocation2 + $0x7] ss:$8 sm:$0xf] %vm1512_vm0, %v500_v41  ;;  %v526_v55 = vcombine.low %v518_v36, %v519_v43  ;;  %v527_v56 = vcombine.low %v520_v47, %v521_v42  ;;  %v555_v41 = vld [vmem:[%s2079_s5 + $0x8] sm:$0xff]  ;;  %v556_v42 = vld [vmem:[%s2079_s5 + $0x10] sm:$0xff]  ;;  %v557_v43 = vld [vmem:[%s2079_s5 + $0x18] sm:$0xff] }
  0xbe   :  { %v568_v47 = vld [vmem:[%s2078_s4 + $0x10] sm:$0xff] }
  0xbf   :  { %v534_v58 = vrot.slane %v526_v55, %v1496_v24  ;;  %v541_v60 = vrot.slane %v527_v56, %v1496_v24  ;;  %v569_v55 = vld [vmem:[%s2078_s4 + $0x18] sm:$0xff]  ;;  %v566_v56 = vld [vmem:[%s2078_s4] sm:$0xff] }
  0xc1   :  { %v542_v61 = vcombine.low %v534_v58, %v541_v60 }
  0xc3   :  { %v549_v62 = vrot.slane %v542_v61, %v1496_v24  ;;  %v567_v61 = vld [vmem:[%s2078_s4 + $0x8] sm:$0xff] }
  0xc4   :  { %v559_v0 = vld [vmem:[#allocation2 + $0x8] sm:$0xff]  ;;  %v561_v1 = vld [vmem:[#allocation2 + $0x18] sm:$0xff]  ;;  %v558_v2 = vld [vmem:[#allocation2] sm:$0xff] }
  0xc5   :  { %552 = vst.msk [vmem:[#allocation2 + $0x20] ss:$8 sm:$0xf] %vm1512_vm0, %v549_v62  ;;  %v560_v37 = vld [vmem:[#allocation2 + $0x10] sm:$0xff] }
  0xcc   :  { %v563_v3 = vld [vmem:[#allocation2 + $0x28] sm:$0x1]  ;;  %v565_v5 = vld [vmem:[#allocation2 + $0x38] sm:$0x1]  ;;  %v562_v27 = vld [vmem:[#allocation2 + $0x20] sm:$0x1] }
  0xcd   :  { %v1310_v28 = vpack.c.bf16 %v563_v3, %v559_v0  ;;  %v1316_v35 = vpack.c.bf16 %v565_v5, %v561_v1  ;;  %v1313_v36 = vpack.c.bf16 %v562_v27, %v558_v2  ;;  %v564_v39 = vld [vmem:[#allocation2 + $0x30] sm:$0x1]  ;;  %v570_v2 = vld [vmem:[%s2078_s4 + $0x20] sm:$0xff]  ;;  %v571_v27 = vld [vmem:[%s2078_s4 + $0x28] sm:$0xff] }
  0xce   :  { %v1319_v32 = vpack.c.bf16 %v564_v39, %v560_v37  ;;  %v572_v3 = vld [vmem:[%s2078_s4 + $0x30] sm:$0xff] }
  0xcf   :  { %1312 = vmatprep.subr.msk.bf16.mxu0 %vm1742_vm11, %v1310_v28  ;;  %1318 = vmatprep.subr.msk.bf16.mxu1 %vm1742_vm11, %v1316_v35  ;;  %v573_v28 = vld [vmem:[%s2078_s4 + $0x38] sm:$0xff] }
  0xd0   :  { %1315 = vmatpush1.bf16.msk.msra.mxu0 %vm1742_vm11, %v1313_v36  ;;  %1321 = vmatpush1.bf16.msk.msra.mxu1 %vm1742_vm11, %v1319_v32 }
  0xd3   :  { %1296 = vmatmul.mubr.msk.f32.vlgmr.msra.gmra.mrb[0].mxu0 %vm582_vm12, %v554_v40  ;;  %1302 = vmatmul.mubr.msk.f32.vlgmr.msra.gmra.mrb[0].mxu1 %vm582_vm12, %v554_v40 }
  0xd4   :  { %678 = vmatprep.mubr.f32.mxu0 %v1375_v33  ;;  %767 = vmatprep.mubr.f32.mxu1 %v1375_v33 }
  0xd7   :  { %1297 = vmatmul.mubr.msk.f32.gmra.mrb[2].mxu0 %vm582_vm12, %v555_v41  ;;  %1303 = vmatmul.mubr.msk.f32.gmra.mrb[2].mxu1 %vm582_vm12, %v555_v41 }
  0xd8   :  { %684 = vmatprep.mubr.f32.mxu0 %v1375_v33  ;;  %773 = vmatprep.mubr.f32.mxu1 %v1375_v33 }
  0xdb   :  { %1298 = vmatmul.mubr.msk.f32.gmra.mrb[4].mxu0 %vm582_vm12, %v556_v42  ;;  %1304 = vmatmul.mubr.msk.f32.gmra.mrb[4].mxu1 %vm582_vm12, %v556_v42 }
  0xdc   :  { %690 = vmatprep.mubr.f32.mxu0 %v1375_v33  ;;  %779 = vmatprep.mubr.f32.mxu1 %v1375_v33 }
  0xdf   :  { %1299 = vmatmul.mubr.msk.f32.gmra.mrb[6].mxu0 %vm582_vm12, %v557_v43  ;;  %1305 = vmatmul.mubr.msk.f32.gmra.mrb[6].mxu1 %vm582_vm12, %v557_v43 }
  0xe0   :  { %875 = vmatprep.mubr.f32.mxu0 %v1375_v33  ;;  %952 = vmatprep.mubr.f32.mxu1 %v1375_v33 }
 0x1a6   :  { %v674_v58 = vpop.f32.mrb[0].mxu0  ;;  %v763_v60 = vpop.f32.mrb[0].mxu1 }
 0x1a7   :  { %v676_v62 = vpop.f32.mrb[1].mxu0  ;;  %v764_v63 = vadd.f32 %v763_v60, %v568_v47  ;;  %v765_v0 = vpop.f32.mrb[1].mxu1  ;;  %v675_v5 = vadd.f32 %v674_v58, %v566_v56  ;;  %v576_v56 = vld [vmem:[%s2078_s4 + $0x50] sm:$0xff] }
 0x1a8   :  { %v766_v1 = vadd.f32 %v765_v0, %v569_v55  ;;  %v677_v35 = vadd.f32 %v676_v62, %v567_v61  ;;  %v577_v61 = vld [vmem:[%s2078_s4 + $0x58] sm:$0xff] }
 0x1a9   :  { %v788_v39 = vmax.f32 %v764_v63, 0.0  ;;  %v786_v58 = vmax.f32 %v675_v5, 0.0  ;;  %v575_v5 = vld [vmem:[%s2078_s4 + $0x48] sm:$0xff] }
 0x1aa   :  { %v680_v36 = vpop.f32.mrb[2].mxu0  ;;  %v769_v37 = vpop.f32.mrb[2].mxu1  ;;  %v789_v43 = vmax.f32 %v766_v1, 0.0  ;;  %v787_v62 = vmax.f32 %v677_v35, 0.0  ;;  %v574_v1 = vld [vmem:[%s2078_s4 + $0x40] sm:$0xff] }
 0x1ab   :  { %v681_v32 = vadd.f32 %v680_v36, %v570_v2  ;;  %v770_v40 = vadd.f32 %v769_v37, %v572_v3  ;;  %v682_v41 = vpop.f32.mrb[3].mxu0  ;;  %v771_v42 = vpop.f32.mrb[3].mxu1 }
 0x1ac   :  { %v683_v47 = vadd.f32 %v682_v41, %v571_v27  ;;  %v772_v55 = vadd.f32 %v771_v42, %v573_v28 }
 0x1ad   :  { %v790_v60 = vmax.f32 %v681_v32, 0.0  ;;  %v792_v0 = vmax.f32 %v770_v40, 0.0 }
 0x1ae   :  { %v791_v63 = vmax.f32 %v683_v47, 0.0  ;;  %v793_v2 = vmax.f32 %v772_v55, 0.0  ;;  %v686_v3 = vpop.f32.mrb[4].mxu0  ;;  %v775_v27 = vpop.f32.mrb[4].mxu1  ;;  %v578_v47 = vld [vmem:[%s2078_s4 + $0x60] sm:$0xff]  ;;  %v580_v55 = vld [vmem:[%s2078_s4 + $0x70] sm:$0xff] }
 0x1af   :  { %v1324_v28 = vpack.c.bf16 %v790_v60, %v786_v58  ;;  %v1332_v36 = vpack.c.bf16 %v792_v0, %v788_v39  ;;  %v688_v37 = vpop.f32.mrb[5].mxu0  ;;  %v776_v32 = vadd.f32 %v775_v27, %v576_v56  ;;  %v777_v40 = vpop.f32.mrb[5].mxu1  ;;  %v687_v58 = vadd.f32 %v686_v3, %v574_v1  ;;  %v579_v39 = vld [vmem:[%s2078_s4 + $0x68] sm:$0xff]  ;;  %v581_v56 = vld [vmem:[%s2078_s4 + $0x78] sm:$0xff] }
 0x1b0   :  { %v1322_v41 = vpack.c.bf16 %v791_v63, %v787_v62  ;;  %v1330_v42 = vpack.c.bf16 %v793_v2, %v789_v43  ;;  %v778_v35 = vadd.f32 %v777_v40, %v577_v61  ;;  %v689_v60 = vadd.f32 %v688_v37, %v575_v5 }
 0x1b1   :  { %v796_v61 = vmax.f32 %v776_v32, 0.0  ;;  %v794_v11 = vmax.f32 %v687_v58, 0.0 }
 0x1b2   :  { %v692_v43 = vpop.f32.mrb[6].mxu0  ;;  %v781_v0 = vpop.f32.mrb[6].mxu1  ;;  %1323 = vmatprep.subr.bf16.mxu0 %v1322_v41  ;;  %1331 = vmatprep.subr.bf16.mxu1 %v1330_v42  ;;  %v797_v1 = vmax.f32 %v778_v35, 0.0  ;;  %v795_v10 = vmax.f32 %v689_v60, 0.0 }
 0x1b3   :  { %v693_v62 = vadd.f32 %v692_v43, %v578_v47  ;;  %v782_v63 = vadd.f32 %v781_v0, %v580_v55  ;;  %v694_v2 = vpop.f32.mrb[7].mxu0  ;;  %v783_v27 = vpop.f32.mrb[7].mxu1  ;;  %1325 = vmatpush1.bf16.msra.mxu0 %v1324_v28  ;;  %1333 = vmatpush1.bf16.msra.mxu1 %v1332_v36  ;;  %v802_v28 = vld [vmem:[%s2080_s6] sm:$0xff] }
 0x1b4   :  { %v695_v3 = vadd.f32 %v694_v2, %v579_v39  ;;  %v784_v40 = vadd.f32 %v783_v27, %v581_v56 }
 0x1b5   :  { %v798_v9 = vmax.f32 %v693_v62, 0.0  ;;  %v800_v12 = vmax.f32 %v782_v63, 0.0 }
 0x1b6   :  { %v799_v30 = vmax.f32 %v695_v3, 0.0  ;;  %v801_v5 = vmax.f32 %v784_v40, 0.0 }
 0x1b7   :  { %v1328_v37 = vpack.c.bf16 %v798_v9, %v794_v11  ;;  %v1336_v38 = vpack.c.bf16 %v800_v12, %v796_v61  ;;  %v803_v9 = vld [vmem:[%s2080_s6 + $0x8] sm:$0x1] }
 0x1b8   :  { %v1326_v41 = vpack.c.bf16 %v799_v30, %v795_v10  ;;  %v1334_v42 = vpack.c.bf16 %v801_v5, %v797_v1 }
 0x1ba   :  { %1327 = vmatprep.subr.bf16.mxu0 %v1326_v41  ;;  %1335 = vmatprep.subr.bf16.mxu1 %v1334_v42 }
 0x1bb   :  { %1329 = vmatpush1.bf16.msra.mxu0 %v1328_v37  ;;  %1337 = vmatpush1.bf16.msra.mxu1 %v1336_v38 }
 0x1be   :  { %1306 = vmatmul.mubr.msk.f32.vlgmr.msra.gmra.mrb[8].mxu0 %vm804_vm13, %v802_v28  ;;  %1308 = vmatmul.mubr.msk.f32.vlgmr.msra.gmra.mrb[8].mxu1 %vm804_vm13, %v802_v28 }
 0x1bf   :  { %881 = vmatprep.mubr.f32.mxu0 %v1375_v33  ;;  %958 = vmatprep.mubr.f32.mxu1 %v1375_v33 }
 0x1c2   :  { %1307 = vmatmul.mubr.msk.f32.gmra.mrb[10].mxu0 %vm804_vm13, %v803_v9  ;;  %1309 = vmatmul.mubr.msk.f32.gmra.mrb[10].mxu1 %vm804_vm13, %v803_v9 }
 0x291   :  { %v1838_v10 = vpop.f32.mrb[8].mxu0  ;;  %v1840_v11 = vpop.f32.mrb[8].mxu1 }
 0x292   :  { %965 = vrot.lane.b32.xlu0 %v1838_v10, %s1366_s0  ;;  %v1844_v12 = vpop.f32.mrb[9].mxu0  ;;  %v1846_v30 = vpop.f32.mrb[9].mxu1  ;;  %v989_v35 = vrot.slane %v1838_v10, 1  ;;  %v991_v55 = vrot.slane %v1840_v11, 1  ;;  %v1017_v39 = vrot.slane %v1838_v10, 2  ;;  %v1019_v60 = vrot.slane %v1840_v11, 2 }
 0x293   :  { %967 = vrot.lane.b32.xlu1 %v1844_v12, %s1366_s0  ;;  %v990_v47 = vrot.slane %v1844_v12, 1  ;;  %v992_v58 = vrot.slane %v1846_v30, 1  ;;  %v1018_v56 = vrot.slane %v1844_v12, 2  ;;  %v1020_v43 = vrot.slane %v1846_v30, 2 }
 0x294   :  { %v1045_v0 = vrot.slane %v1838_v10, 3  ;;  %v1046_v61 = vrot.slane %v1844_v12, 3  ;;  %v1047_v62 = vrot.slane %v1840_v11, 3  ;;  %v1048_v63 = vrot.slane %v1846_v30, 3 }
 0x295   :  { %v883_v38 = vpop.f32.mrb[10].mxu0  ;;  %v960_v36 = vpop.f32.mrb[10].mxu1  ;;  %v1093_v2 = vrot.slane %v1838_v10, 5  ;;  %v1094_v27 = vrot.slane %v1844_v12, 5  ;;  %v1095_v1 = vrot.slane %v1840_v11, 5  ;;  %v1096_v3 = vrot.slane %v1846_v30, 5 }
 0x296   :  { %969 = vrot.lane.b32.xlu0 %v1840_v11, %s1366_s0  ;;  %v885_v33 = vpop.f32.mrb[11].mxu0  ;;  %v962_v32 = vpop.f32.mrb[11].mxu1  ;;  %v1121_v40 = vrot.slane %v1838_v10, 6  ;;  %v1122_v5 = vrot.slane %v1844_v12, 6  ;;  %v1123_v37 = vrot.slane %v1840_v11, 6  ;;  %v1124_v41 = vrot.slane %v1846_v30, 6 }
 0x297   :  { %971 = vrot.lane.b32.xlu1 %v1846_v30, %s1366_s0  ;;  %v1149_v42 = vrot.slane %v1838_v10, 7  ;;  %v1150_v28 = vrot.slane %v1844_v12, 7  ;;  %v1151_v9 = vrot.slane %v1840_v11, 7  ;;  %v1922_v31 = vmul.f32 %v1844_v12, %v1488_v22 }
 0x29a   :  { %997 = vrot.lane.b32.xlu0 %v989_v35, %s1367_s2  ;;  %v1152_v35 = vrot.slane %v1846_v30, 7 }
 0x29b   :  { %999 = vrot.lane.b32.xlu1 %v990_v47, %s1367_s2 }
 0x29e   :  { %1001 = vrot.lane.b32.xlu0 %v991_v55, %s1367_s2 }
 0x29f   :  { %1003 = vrot.lane.b32.xlu1 %v992_v58, %s1367_s2 }
 0x2a2   :  { %1025 = vrot.lane.b32.xlu0 %v1017_v39, %s1368_s3 }
 0x2a3   :  { %1027 = vrot.lane.b32.xlu1 %v1018_v56, %s1368_s3 }
 0x2a6   :  { %1029 = vrot.lane.b32.xlu0 %v1019_v60, %s1368_s3 }
 0x2a7   :  { %1031 = vrot.lane.b32.xlu1 %v1020_v43, %s1368_s3 }
 0x2aa   :  { %1053 = vrot.lane.b32.xlu0 %v1045_v0, %s1369_s17 }
 0x2ab   :  { %1055 = vrot.lane.b32.xlu1 %v1046_v61, %s1369_s17 }
 0x2ae   :  { %1057 = vrot.lane.b32.xlu0 %v1047_v62, %s1369_s17 }
 0x2af   :  { %1059 = vrot.lane.b32.xlu1 %v1048_v63, %s1369_s17 }
 0x2b2   :  { %1101 = vrot.lane.b32.xlu0 %v1093_v2, %s1371_s18 }
 0x2b3   :  { %1103 = vrot.lane.b32.xlu1 %v1094_v27, %s1371_s18 }
 0x2b6   :  { %1105 = vrot.lane.b32.xlu0 %v1095_v1, %s1371_s18 }
 0x2b7   :  { %1107 = vrot.lane.b32.xlu1 %v1096_v3, %s1371_s18 }
 0x2ba   :  { %1129 = vrot.lane.b32.xlu0 %v1121_v40, %s1372_s27 }
 0x2bb   :  { %1131 = vrot.lane.b32.xlu1 %v1122_v5, %s1372_s27 }
 0x2be   :  { %1133 = vrot.lane.b32.xlu0 %v1123_v37, %s1372_s27 }
 0x2bf   :  { %1135 = vrot.lane.b32.xlu1 %v1124_v41, %s1372_s27  ;;  %s1354_s27 = scalar_lea.hbm %s2083_s9, 16 }
 0x2c0   :  { %p1355_p0 = scmp.ne.s32.totalorder %s2083_s9, %s1354_s27  ;;  %p1358_p1 = scmp.lt.u32.totalorder %s1354_s27, %s2083_s9 }
 0x2c2   :  { %1157 = vrot.lane.b32.xlu0 %v1149_v42, %s1373_s28  ;;  %p1360_p2 = pnand %p1358_p1, %p1355_p0 }
 0x2c3   :  { %1159 = vrot.lane.b32.xlu1 %v1150_v28, %s1373_s28 }
 0x2c6   :  { %1161 = vrot.lane.b32.xlu0 %v1151_v9, %s1373_s28 }
 0x2c7   :  { %1163 = vrot.lane.b32.xlu1 %v1152_v35, %s1373_s28  ;;  %v1073_v35 = vmul.f32 %v1838_v10, %v1478_v20 }
 0x2ca   :  { %1177 = vrot.lane.b32.xlu0 %v883_v38, %s1374_s29 }
 0x2cb   :  { %1179 = vrot.lane.b32.xlu1 %v885_v33, %s1374_s29 }
 0x2ce   :  { %1181 = vrot.lane.b32.xlu0 %v960_v36, %s1374_s29 }
 0x2cf   :  { %1183 = vrot.lane.b32.xlu1 %v962_v32, %s1374_s29 }
 0x304   :  { %v966_v47 = vpop.permute.xlu0 %965 }
 0x305   :  { %v968_v55 = vpop.permute.xlu1 %967 }
 0x306   :  { %v975_v49 = vsel %vm86_vm1, %v966_v47, %v968_v55 }
 0x308   :  { %v970_v58 = vpop.permute.xlu0 %969 }
 0x309   :  { %v972_v39 = vpop.permute.xlu1 %971 }
 0x30a   :  { %v976_v37 = vsel %vm86_vm1, %v972_v39, %v966_v47 }
 0x30b   :  { %v977_v10 = vmul.f32 %v976_v37, %v1478_v20 }
 0x30c   :  { %v998_v56 = vpop.permute.xlu0 %997 }
 0x30d   :  { %v1000_v60 = vpop.permute.xlu1 %999 }
 0x30e   :  { %v1007_v41 = vsel %vm138_vm2, %v998_v56, %v1000_v60 }
 0x30f   :  { %v1010_v12 = vmul.f32 %v1007_v41, %v148_v51  ;;  %v978_v51 = vmul.f32 %v975_v49, %v1488_v22 }
 0x310   :  { %v1002_v43 = vpop.permute.xlu0 %1001 }
 0x311   :  { %v1004_v0 = vpop.permute.xlu1 %1003  ;;  %v1006_v42 = vsel %vm138_vm2, %v1000_v60, %v1002_v43  ;;  %v973_v60 = vsel %vm86_vm1, %v970_v58, %v972_v39 }
 0x312   :  { %v1008_v32 = vsel %vm138_vm2, %v1004_v0, %v998_v56  ;;  %v974_v56 = vsel %vm86_vm1, %v968_v55, %v970_v58  ;;  %v1011_v59 = vmul.f32 %v1006_v42, %v149_v53  ;;  %v980_v49 = vmul.f32 %v973_v60, %v1483_v21 }
 0x313   :  { %v1009_v28 = vmul.f32 %v1008_v32, %v147_v52  ;;  %v1005_v52 = vsel %vm138_vm2, %v1002_v43, %v1004_v0  ;;  %v979_v53 = vmul.f32 %v974_v56, %v1493_v23 }
 0x314   :  { %v1026_v61 = vpop.permute.xlu0 %1025  ;;  %v1012_v37 = vmul.f32 %v1005_v52, %v150_v57  ;;  %v1081_v52 = vrot.slane %v1073_v35, 4 }
 0x315   :  { %v1028_v62 = vpop.permute.xlu1 %1027  ;;  %v1013_v41 = vadd.f32 %v1009_v28, %v977_v10 }
 0x316   :  { %v1035_v58 = vsel %vm199_vm3, %v1026_v61, %v1028_v62 }
 0x317   :  { %v1038_v42 = vmul.f32 %v1035_v58, %v205_v14 }
 0x318   :  { %v1030_v63 = vpop.permute.xlu0 %1029 }
 0x319   :  { %v1032_v2 = vpop.permute.xlu1 %1031  ;;  %v1034_v39 = vsel %vm199_vm3, %v1028_v62, %v1030_v63 }
 0x31a   :  { %v1036_v9 = vsel %vm199_vm3, %v1032_v2, %v1026_v61  ;;  %v1033_v43 = vsel %vm199_vm3, %v1030_v63, %v1032_v2  ;;  %v1039_v57 = vmul.f32 %v1034_v39, %v206_v16 }
 0x31b   :  { %v1037_v0 = vmul.f32 %v1036_v9, %v204_v15  ;;  %v1015_v9 = vadd.f32 %v1011_v59, %v979_v53  ;;  %v1076_v59 = vmul.f32 %v1846_v30, %v1483_v21 }
 0x31c   :  { %v1054_v27 = vpop.permute.xlu0 %1053 }
 0x31d   :  { %v1056_v38 = vpop.permute.xlu1 %1055  ;;  %v1041_v56 = vadd.f32 %v1037_v0, %v1013_v41 }
 0x31e   :  { %v1063_v61 = vsel %vm256_vm4, %v1054_v27, %v1056_v38 }
 0x320   :  { %v1058_v1 = vpop.permute.xlu0 %1057 }
 0x321   :  { %v1060_v33 = vpop.permute.xlu1 %1059  ;;  %v1062_v62 = vsel %vm256_vm4, %v1056_v38, %v1058_v1  ;;  %v1014_v38 = vadd.f32 %v1010_v12, %v978_v51 }
 0x322   :  { %v1064_v47 = vsel %vm256_vm4, %v1060_v33, %v1054_v27  ;;  %v1061_v63 = vsel %vm256_vm4, %v1058_v1, %v1060_v33  ;;  %v1040_v27 = vmul.f32 %v1033_v43, %v207_v25  ;;  %v1075_v1 = vmul.f32 %v1840_v11, %v1493_v23 }
 0x323   :  { %v1065_v15 = vmul.f32 %v1064_v47, %v261_v45  ;;  %v1016_v45 = vadd.f32 %v1012_v37, %v980_v49  ;;  %v1066_v33 = vmul.f32 %v1063_v61, %v262_v44  ;;  %v1067_v14 = vmul.f32 %v1062_v62, %v263_v46 }
 0x324   :  { %v1102_v3 = vpop.permute.xlu0 %1101  ;;  %v1068_v16 = vmul.f32 %v1061_v63, %v264_v50  ;;  %v1082_v25 = vrot.slane %v1922_v31, 4  ;;  %v1042_v12 = vadd.f32 %v1038_v42, %v1014_v38  ;;  %v1043_v11 = vadd.f32 %v1039_v57, %v1015_v9 }
 0x325   :  { %v1104_v36 = vpop.permute.xlu1 %1103  ;;  %v1069_v60 = vadd.f32 %v1065_v15, %v1041_v56  ;;  %v1044_v47 = vadd.f32 %v1040_v27, %v1016_v45  ;;  %v1083_v39 = vrot.slane %v1075_v1, 4  ;;  %v1084_v37 = vrot.slane %v1076_v59, 4 }
 0x326   :  { %v1111_v44 = vsel %vm342_vm5, %v1102_v3, %v1104_v36  ;;  %v1070_v35 = vadd.f32 %v1066_v33, %v1042_v12  ;;  %v1071_v30 = vadd.f32 %v1067_v14, %v1043_v11  ;;  %v2098_v9 = vrot.slane %v1483_v21, 6 }
 0x327   :  { %v1072_v43 = vadd.f32 %v1068_v16, %v1044_v47  ;;  %v1089_v51 = vadd.f32 %v1081_v52, %v1069_v60  ;;  %v1113_v53 = vmul.f32 %v1111_v44, %v347_v6  ;;  %v2100_v60 = vrot.slane %v1493_v23, 7 }
 0x328   :  { %v1106_v40 = vpop.permute.xlu0 %1105  ;;  %v1090_v63 = vadd.f32 %v1082_v25, %v1070_v35  ;;  %v1091_v15 = vadd.f32 %v1083_v39, %v1071_v30  ;;  %v2101_v25 = vrot.slane %v1483_v21, 7 }
 0x329   :  { %v1108_v5 = vpop.permute.xlu1 %1107  ;;  %v1110_v46 = vsel %vm342_vm5, %v1104_v36, %v1106_v40  ;;  %v1117_v42 = vadd.f32 %v1113_v53, %v1089_v51 }
 0x32a   :  { %v1109_v50 = vsel %vm342_vm5, %v1106_v40, %v1108_v5  ;;  %v1112_v31 = vsel %vm342_vm5, %v1108_v5, %v1102_v3  ;;  %v1114_v40 = vmul.f32 %v1110_v46, %v348_v13 }
 0x32b   :  { %v1115_v3 = vmul.f32 %v1109_v50, %v349_v26  ;;  %v1116_v5 = vmul.f32 %v1112_v31, %v350_v8  ;;  %v1092_v8 = vadd.f32 %v1084_v37, %v1072_v43 }
 0x32c   :  { %v1932_v32 = vpop.permute.xlu0 %1129  ;;  %v1118_v27 = vadd.f32 %v1114_v40, %v1090_v63 }
 0x32d   :  { %v1132_v55 = vpop.permute.xlu1 %1131  ;;  %v1119_v20 = vadd.f32 %v1115_v3, %v1091_v15  ;;  %v2104_v15 = vsub.s32 2, %v1441_v7 }
 0x32e   :  { %v1139_v0 = vsel %vm399_vm6, %v1932_v32, %v1132_v55 }
 0x32f   :  { %v1141_v6 = vmul.f32 %v1139_v0, %v404_v48 }
 0x330   :  { %v1134_v2 = vpop.permute.xlu0 %1133 }
 0x331   :  { %v1136_v28 = vpop.permute.xlu1 %1135  ;;  %v1138_v36 = vsel %vm399_vm6, %v1132_v55, %v1134_v2  ;;  %v1145_v33 = vadd.f32 %v1141_v6, %v1117_v42 }
 0x332   :  { %v1137_v55 = vsel %vm399_vm6, %v1134_v2, %v1136_v28  ;;  %v1140_v13 = vsel %vm399_vm6, %v1136_v28, %v1932_v32  ;;  %v1142_v49 = vmul.f32 %v1138_v36, %v405_v54  ;;  %v2097_v28 = vrot.slane %v1493_v23, 6 }
 0x333   :  { %v1144_v56 = vmul.f32 %v1140_v13, %v2098_v9  ;;  %v2099_v54 = vrot.slane %v1488_v22, 7  ;;  %v1198_v22 = vstv %s2082_s8 }
 0x334   :  { %v1158_v10 = vpop.permute.xlu0 %1157  ;;  %v1143_v38 = vmul.f32 %v1137_v55, %v2097_v28  ;;  %v1146_v16 = vadd.f32 %v1142_v49, %v1118_v27  ;;  %v2102_v55 = vsub.s32 0, %v1441_v7  ;;  %v2105_v49 = vsub.s32 3, %v1441_v7 }
 0x335   :  { %v1160_v58 = vpop.permute.xlu1 %1159 }
 0x336   :  { %v1167_v61 = vsel %vm456_vm7, %v1158_v10, %v1160_v58  ;;  %v1147_v47 = vadd.f32 %v1143_v38, %v1119_v20 }
 0x337   :  { %v1169_v48 = vmul.f32 %v1167_v61, %v461_v29  ;;  %v1120_v29 = vadd.f32 %v1116_v5, %v1092_v8 }
 0x338   :  { %v1162_v41 = vpop.permute.xlu0 %1161 }
 0x339   :  { %v1164_v62 = vpop.permute.xlu1 %1163  ;;  %v1166_v26 = vsel %vm456_vm7, %v1160_v58, %v1162_v41  ;;  %v1173_v12 = vadd.f32 %v1169_v48, %v1145_v33  ;;  %v1148_v44 = vadd.f32 %v1144_v56, %v1120_v29 }
 0x33a   :  { %v1165_v2 = vsel %vm456_vm7, %v1162_v41, %v1164_v62  ;;  %v1168_v57 = vsel %vm456_vm7, %v1164_v62, %v1158_v10  ;;  %v1170_v1 = vmul.f32 %v1166_v26, %v2099_v54  ;;  %v2103_v26 = vsub.s32 1, %v1441_v7 }
 0x33b   :  { %v1171_v52 = vmul.f32 %v1165_v2, %v2100_v60  ;;  %v1172_v59 = vmul.f32 %v1168_v57, %v2101_v25 }
 0x33c   :  { %v1178_v32 = vpop.permute.xlu0 %1177  ;;  %v1174_v58 = vadd.f32 %v1170_v1, %v1146_v16 }
 0x33d   :  { %v1180_v45 = vpop.permute.xlu1 %1179  ;;  %v1175_v31 = vadd.f32 %v1171_v52, %v1147_v47  ;;  %v1176_v35 = vadd.f32 %v1172_v59, %v1148_v44 }
 0x33e   :  { %v1187_v14 = vsel %vm513_vm8, %v1178_v32, %v1180_v45 }
 0x33f   :  { %v1189_v10 = vmul.f32 %v1187_v14, %v1704_v4 }
 0x340   :  { %v1182_v11 = vpop.permute.xlu0 %1181 }
 0x341   :  { %v1186_v46 = vsel %vm513_vm8, %v1180_v45, %v1182_v11  ;;  %v1184_v39 = vpop.permute.xlu1 %1183  ;;  %v1193_v23 = vadd.f32 %v1189_v10, %v1173_v12 }
 0x342   :  { %v1190_v50 = vmul.f32 %v1186_v46, %v1716_v18  ;;  %v1185_v21 = vsel %vm513_vm8, %v1182_v11, %v1184_v39  ;;  %v1188_v4 = vsel %vm513_vm8, %v1184_v39, %v1178_v32 }
 0x343   :  { %v1191_v30 = vmul.f32 %v1185_v21, %v1721_v19  ;;  %v1192_v43 = vmul.f32 %v1188_v4, %v1711_v17  ;;  %v1199_v37 = vadd.f32 %v1198_v22, %v1193_v23  ;;  %v1353_v17 = vld [vmem:[%s2075_s1] sm:$0xf] }
 0x344   :  { %v1194_v0 = vadd.f32 %v1190_v50, %v1174_v58 }
 0x345   :  { %v1195_v51 = vadd.f32 %v1191_v30, %v1175_v31  ;;  %v1196_v53 = vadd.f32 %v1192_v43, %v1176_v35 }
 0x346   :  { %v1200_v36 = vadd.f32 %v1198_v22, %v1194_v0 }
 0x347   :  { %v1201_v41 = vadd.f32 %v1198_v22, %v1195_v51  ;;  %v1202_v40 = vadd.f32 %v1198_v22, %v1196_v53 }
 0x348   :  { %v1207_v18 = vcombine.low %v1199_v37, %v1200_v36 }
 0x349   :  { %v1208_v3 = vcombine.low %v1201_v41, %v1202_v40 }
 0x34a   :  { %v1215_v5 = vrot.slane %v1207_v18, %v1496_v24 }
 0x34b   :  { %v1222_v34 = vrot.slane %v1208_v3, %v1496_v24 }
 0x34d   :  { %v1223_v61 = vcombine.low %v1215_v5, %v1222_v34 }
 0x34f   :  { %v1230_v62 = vrot.slane %v1223_v61, %v1496_v24 }
 0x351   :  { %v1232_v19 = vsub.f32 %v1353_v17, %v1230_v62 }
 0x353   :  { %v1234_v6 = vmul.f32 %v1232_v19, %v1232_v19 }
 0x355   :  { %v1239_v13 = vrot.slane %v1234_v6, %v2102_v55  ;;  %v1243_v63 = vrot.slane %v1234_v6, %v2103_v26  ;;  %v1247_v8 = vrot.slane %v1234_v6, %v2104_v15  ;;  %v1251_v42 = vrot.slane %v1234_v6, %v2105_v49 }
 0x357   :  { %v1256_v24 = vsel %vm595_vm9, %v1239_v13, 0.0  ;;  %v1257_v48 = vsel %vm595_vm9, %v1243_v63, 0.0  ;;  %v1259_v57 = vsel %vm595_vm9, %v1247_v8, 0.0  ;;  %v1261_v27 = vsel %vm595_vm9, %v1251_v42, 0.0 }
 0x358   :  { %v1258_v2 = vadd.f32 %v1257_v48, %v1256_v24 }
 0x35a   :  { %v1260_v32 = vadd.f32 %v1259_v57, %v1258_v2 }
 0x35c   :  { %v1262_v28 = vadd.f32 %v1261_v27, %v1260_v32 }
 0x35e   :  { %1263 = vadd.xlane.f32.xlu0 %v1262_v28 }
 0x3eb   :  { %v1264_v38 = vpop.xlane.xlu0 %1263 }
 0x3ec   :  { %v1265_v9 = vrot.slane %v1264_v38, 4 }
 0x3ee   :  { %v1266_v56 = vadd.f32 %v1265_v9, %v1264_v38 }
 0x3f0   :  { %v1267_v54 = vrot.slane %v1266_v56, 2 }
 0x3f2   :  { %v1268_v1 = vadd.f32 %v1267_v54, %v1266_v56 }
 0x3f4   :  { %v1269_v45 = vrot.slane %v1268_v1, 1 }
 0x3f6   :  { %v1270_v7 = vadd.f32 %v1269_v45, %v1268_v1 }
 0x3f8   :  { %1338 = vpush %v1270_v7 }
 0x429   :  { %s1339_s1 = spop %1338 }
 0x42a   :  { %s1279_s3 = smul.f32 0.001953125, %s1339_s1 }
 0x42c   :  { %1280 = sst [smem:[#allocation4]] %s1279_s3 }
 0x42d   :  { %1363 = shalt.err (!%p1360_p2)
}
 0x42e   :  { %s1377_s30 = smov [#allocation4]  }
 0x42f   :  { %1288 = dma.smem_to_hbm %s1377_s30, 16, %s2083_s9, [#allocation5]  }
 0x430   :  { %1364 = dma.done.wait [#allocation5], 16  }
 0x431   :  { %1365 = vsyncadd [#allocation5], 4294967280 }
 0x432   :  { %1292 = sfence }
 0x433   :  { %1293 = vsyncpa [#allocation5], 1 }

</bundles_post_ra>
